<compile_context>
chip_gen: v6e
topology: v6e:2x2x1
jax: 0.10.0
libtpu: 0.0.40
codegen_flags: <defaults>
</compile_context>

<pallas_src>
import functools

import jax
import jax.numpy as jnp
from jax import lax
from jax.experimental import pallas as pl
from jax.experimental.pallas import tpu as pltpu

EPS = 1e-5


# ----------------------------- kernel helpers ------------------------------ #

def _build_cols(x, cols_ref, W):
  """x: (C, H*W) f32 value, channels in sublanes, flattened spatial in lanes.

  Writes the 9 shifted / zero-masked copies (tap-major, tap = kh*3 + kw) into
  cols_ref (9*C, H*W) so the 3x3 'SAME' conv becomes a single MXU matmul.
  A zero pad of W+1 lanes on each side makes every tap a *static* lane slice;
  the left/right column wrap is removed with lane-index masks.
  """
  C, HW = x.shape
  pad = jnp.zeros((C, W + 1), x.dtype)
  xp = jnp.concatenate([pad, x, pad], axis=1)            # (C, HW + 2W + 2)
  w_idx = lax.broadcasted_iota(jnp.int32, (C, HW), 1) % W
  not_last = w_idx != (W - 1)                            # hoisted out of loop
  not_first = w_idx != 0
  tap = 0
  for dh in (-1, 0, 1):                                  # static 3x3 taps
    for dw in (-1, 0, 1):
      s = dh * W + dw
      sh = xp[:, (W + 1) + s:(W + 1) + s + HW]           # == x[:, p + s] or 0
      if dw == 1:
        sh = jnp.where(not_last, sh, 0.0)
      elif dw == -1:
        sh = jnp.where(not_first, sh, 0.0)
      cols_ref[tap * C:(tap + 1) * C, :] = sh            # sublane-aligned rows
      tap += 1


def _matmul_stats(cols_ref, w_ref, b_ref, o_ref, s_ref, q_ref):
  """Y = Wmat @ cols (+bias); also per-image channel sum / sum-of-squares."""
  acc = jnp.dot(w_ref[...], cols_ref[...].astype(jnp.bfloat16),
                preferred_element_type=jnp.float32) + b_ref[...]
  s_ref[0] = jnp.sum(acc, axis=1, keepdims=True)
  q_ref[0] = jnp.sum(acc * acc, axis=1, keepdims=True)
  o_ref[0] = acc                                          # lane-dense store


# ----------------------------- kernel bodies ------------------------------- #

def _conv1_kernel(u_ref, w_ref, b_ref, o_ref, s_ref, q_ref, cols_ref, *, W):
  """Conv2d(3x3, pad=1) on the unpooled tensor for one image + BN1 stats."""
  _build_cols(u_ref[0], cols_ref, W)
  _matmul_stats(cols_ref, w_ref, b_ref, o_ref, s_ref, q_ref)


def _conv2_kernel(x_ref, sc_ref, sh_ref, w_ref, b_ref,
                  o_ref, s_ref, q_ref, cols_ref, *, W):
  """BN1 (precomputed scale/shift) + ReLU fused into the conv2 prologue."""
  h = jnp.maximum(x_ref[0] * sc_ref[...] + sh_ref[...], 0.0)
  _build_cols(h, cols_ref, W)
  _matmul_stats(cols_ref, w_ref, b_ref, o_ref, s_ref, q_ref)


def _bn_relu_kernel(x_ref, sc_ref, sh_ref, o_ref):
  """Final BN2 + ReLU with precomputed per-channel scale/shift."""
  o_ref[0] = jnp.maximum(x_ref[0] * sc_ref[...] + sh_ref[...], 0.0)


# ----------------------------- pallas_call wrappers ------------------------ #

def _conv_bn_stats(x, w_mat, b, W, bn=None):
  """x: (N, Cin, H*W) f32; w_mat: (Cout, 9*Cin) bf16 tap-major; b: (Cout,).

  If bn=(scale, shift) (each (Cin, 1)), BN+ReLU is applied to x inside the
  kernel before the convolution (kernel B); otherwise plain conv (kernel A).
  Returns (y, sum, sum_sq) with y: (N, Cout, H*W), stats: (N, Cout, 1).
  """
  N, Cin, HW = x.shape
  Cout = w_mat.shape[0]
  out_shape = (
      jax.ShapeDtypeStruct((N, Cout, HW), jnp.float32),
      jax.ShapeDtypeStruct((N, Cout, 1), jnp.float32),
      jax.ShapeDtypeStruct((N, Cout, 1), jnp.float32),
  )
  x_spec = pl.BlockSpec((1, Cin, HW), lambda n: (n, 0, 0))
  w_spec = pl.BlockSpec((Cout, 9 * Cin), lambda n: (0, 0))
  b_spec = pl.BlockSpec((Cout, 1), lambda n: (0, 0))
  out_specs = (
      pl.BlockSpec((1, Cout, HW), lambda n: (n, 0, 0)),
      pl.BlockSpec((1, Cout, 1), lambda n: (n, 0, 0)),
      pl.BlockSpec((1, Cout, 1), lambda n: (n, 0, 0)),
  )
  scratch = [pltpu.VMEM((9 * Cin, HW), jnp.float32)]
  cp = pltpu.CompilerParams(dimension_semantics=("parallel",))

  if bn is None:
    return pl.pallas_call(
        functools.partial(_conv1_kernel, W=W),
        out_shape=out_shape, grid=(N,),
        in_specs=[x_spec, w_spec, b_spec],
        out_specs=out_specs, scratch_shapes=scratch, compiler_params=cp,
    )(x, w_mat, b.reshape(Cout, 1))

  scale, shift = bn
  c_spec = pl.BlockSpec((Cin, 1), lambda n: (0, 0))
  return pl.pallas_call(
      functools.partial(_conv2_kernel, W=W),
      out_shape=out_shape, grid=(N,),
      in_specs=[x_spec, c_spec, c_spec, w_spec, b_spec],
      out_specs=out_specs, scratch_shapes=scratch, compiler_params=cp,
  )(x, scale, shift, w_mat, b.reshape(Cout, 1))


def _bn_relu(x, scale, shift):
  N, C, HW = x.shape
  return pl.pallas_call(
      _bn_relu_kernel,
      out_shape=jax.ShapeDtypeStruct((N, C, HW), jnp.float32),
      grid=(N,),
      in_specs=[
          pl.BlockSpec((1, C, HW), lambda n: (n, 0, 0)),
          pl.BlockSpec((C, 1), lambda n: (0, 0)),
          pl.BlockSpec((C, 1), lambda n: (0, 0)),
      ],
      out_specs=pl.BlockSpec((1, C, HW), lambda n: (n, 0, 0)),
      compiler_params=pltpu.CompilerParams(dimension_semantics=("parallel",)),
  )(x, scale, shift)


# ----------------------------- module forward ------------------------------ #

def _bn_scale_shift(s, q, gamma, beta, count):
  """Per-channel scale/shift of training-mode BN from per-image sums."""
  total = jnp.sum(s[:, :, 0], axis=0)
  total_sq = jnp.sum(q[:, :, 0], axis=0)
  mean = total / count
  var = total_sq / count - mean * mean               # biased variance
  scale = gamma * lax.rsqrt(var + EPS)
  shift = beta - mean * scale
  return scale.reshape(-1, 1), shift.reshape(-1, 1)


@functools.partial(jax.jit, static_argnames=("size",))
def decoder_forward(x, indices, size, params):
  """x, indices: (N, Cin, Hp, Wp) NCHW (PyTorch convention); size=(N,Cin,H,W)."""
  N, Cin, _, _ = x.shape
  H, W = size[2], size[3]
  Cmid = params["w1"].shape[3]
  Cout = params["w2"].shape[3]

  # ---- glue: max_unpool2d as ONE fused XLA select at output resolution; only
  # the masked VALUES reach the kernels (the int32 index plane never does) ----
  x_up = jnp.repeat(jnp.repeat(x.astype(jnp.float32), 2, axis=2), 2, axis=3)
  idx_up = jnp.repeat(jnp.repeat(indices.astype(jnp.int32), 2, axis=2), 2, axis=3)
  pos = (jnp.arange(H, dtype=jnp.int32)[:, None] * W
         + jnp.arange(W, dtype=jnp.int32)[None, :])
  unpooled = jnp.where(idx_up == pos, x_up, 0.0).reshape(N, Cin, H * W)

  # im2col weights: HWIO (3,3,Ci,Co) -> (Co, 9*Ci), tap-major (kh,kw); bf16.
  w1 = jnp.transpose(params["w1"], (3, 0, 1, 2)).reshape(Cmid, 9 * Cin)
  w2 = jnp.transpose(params["w2"], (3, 0, 1, 2)).reshape(Cout, 9 * Cmid)
  w1 = w1.astype(jnp.bfloat16)
  w2 = w2.astype(jnp.bfloat16)
  cnt = float(N * H * W)

  # ---- block 1: conv1 (single im2col MXU matmul) + BN1 stats in one pass ----
  c1, s1, q1 = _conv_bn_stats(unpooled, w1, params["b1"], W)
  scale1, shift1 = _bn_scale_shift(s1, q1, params["g1"], params["be1"], cnt)

  # ---- block 2: BN1+ReLU fused into conv2 prologue; conv2 + BN2 stats ----
  c2, s2, q2 = _conv_bn_stats(c1, w2, params["b2"], W, bn=(scale1, shift1))
  scale2, shift2 = _bn_scale_shift(s2, q2, params["g2"], params["be2"], cnt)

  # ---- final BN2 + ReLU (single elementwise pass, grid over N) ----
  out = _bn_relu(c2, scale2, shift2)
  return out.reshape(N, Cout, H, W)               # already NCHW


# ----------------------------- pure-JAX reference -------------------------- #

def _reference(x, indices, size, params):
  """Independent NCHW reference (bf16 matmul operands, f32 accumulation)."""
  N, Cin, _, _ = x.shape
  H, W = size[2], size[3]
  flat = jnp.zeros((N, Cin, H * W), jnp.float32)
  n_idx = jnp.arange(N)[:, None, None]
  c_idx = jnp.arange(Cin)[None, :, None]
  flat = flat.at[n_idx, c_idx, indices.reshape(N, Cin, -1)].set(
      x.reshape(N, Cin, -1))
  y = flat.reshape(N, Cin, H, W)

  def conv(xi, w_hwio, b):
    w_oihw = jnp.transpose(w_hwio, (3, 2, 0, 1)).astype(jnp.bfloat16)
    out = lax.conv_general_dilated(
        xi.astype(jnp.bfloat16), w_oihw, (1, 1), "SAME",
        dimension_numbers=("NCHW", "OIHW", "NCHW"),
        preferred_element_type=jnp.float32)
    return out + b[None, :, None, None]

  def bn_relu(xi, g, be):
    mean = jnp.mean(xi, axis=(0, 2, 3), keepdims=True)
    var = jnp.mean(jnp.square(xi - mean), axis=(0, 2, 3), keepdims=True)
    out = (xi - mean) * lax.rsqrt(var + EPS)
    out = out * g[None, :, None, None] + be[None, :, None, None]
    return jnp.maximum(out, 0.0)

  y = bn_relu(conv(y, params["w1"], params["b1"]), params["g1"], params["be1"])
  y = bn_relu(conv(y, params["w2"], params["b2"]), params["g2"], params["be2"])
  return y


# ----------------------------- main ---------------------------------------- #

if __name__ == "__main__":
  key = jax.random.PRNGKey(0)
  ks = jax.random.split(key, 12)

  N, Cin, Cout = 2, 8, 4
  Hp = Wp = 8
  H, W = 2 * Hp, 2 * Wp
  size = (N, Cin, H, W)

  # pooled features + valid max-pool indices (each points inside its 2x2 window)
  x = jax.random.normal(ks[0], (N, Cin, Hp, Wp), jnp.float32)
  di = jax.random.randint(ks[1], (N, Cin, Hp, Wp), 0, 2)
  dj = jax.random.randint(ks[2], (N, Cin, Hp, Wp), 0, 2)
  ih = jnp.arange(Hp)[:, None]
  iw = jnp.arange(Wp)[None, :]
  indices = ((2 * ih + di) * W + (2 * iw + dj)).astype(jnp.int32)

  # deterministic synthetic parameters (shapes from _Decoder.__init__), HWIO
  params = {
      "w1": 0.1 * jax.random.normal(ks[3], (3, 3, Cin, Cin), jnp.float32),
      "b1": 0.1 * jax.random.normal(ks[4], (Cin,), jnp.float32),
      "g1": 1.0 + 0.1 * jax.random.normal(ks[5], (Cin,), jnp.float32),
      "be1": 0.1 * jax.random.normal(ks[6], (Cin,), jnp.float32),
      "w2": 0.1 * jax.random.normal(ks[7], (3, 3, Cin, Cout), jnp.float32),
      "b2": 0.1 * jax.random.normal(ks[8], (Cout,), jnp.float32),
      "g2": 1.0 + 0.1 * jax.random.normal(ks[9], (Cout,), jnp.float32),
      "be2": 0.1 * jax.random.normal(ks[10], (Cout,), jnp.float32),
  }

  out = decoder_forward(x, indices, size, params)
  out = jax.block_until_ready(out)
  assert out.shape == (N, Cout, H, W), out.shape

  ref = _reference(x, indices, size, params)
  err = float(jnp.max(jnp.abs(out - ref)))
  # bf16 MXU operands on both sides; tolerance covers bf16 rounding divergence
  # of the intermediate activations (typical error ~1e-4).
  assert err < 1e-2, f"max abs error {err}"

  print("KERNEL_OK")
</pallas_src>

<mosaic_0001>
module attributes {stable_mosaic.version = 11 : i64} {
  func.func @_conv1_kernel(%arg0: i32, %arg1: memref<1x8x256xf32, #tpu.memory_space<vmem>>, %arg2: memref<8x72xbf16, #tpu.memory_space<vmem>>, %arg3: memref<8x1xf32, #tpu.memory_space<vmem>>, %arg4: memref<1x8x256xf32, #tpu.memory_space<vmem>>, %arg5: memref<1x8x1xf32, #tpu.memory_space<vmem>>, %arg6: memref<1x8x1xf32, #tpu.memory_space<vmem>>, %arg7: memref<72x256xf32, #tpu.memory_space<vmem>>) attributes {dimension_semantics = [#tpu.dimension_semantics<parallel>], iteration_bounds = array<i64: 2>, scalar_prefetch = 0 : i64, scratch_operands = 1 : i64, tpu.core_type = #tpu.core_type<tc>, window_params = [{transform_indices = @transform_0, window_bounds = array<i64: 1, 8, 256>}, {pipeline_mode = #tpu.pipeline_mode<synchronous>, transform_indices = @transform_1, window_bounds = array<i64: 8, 72>}, {pipeline_mode = #tpu.pipeline_mode<synchronous>, transform_indices = @transform_2, window_bounds = array<i64: 8, 1>}, {transform_indices = @transform_3, window_bounds = array<i64: 1, 8, 256>}, {transform_indices = @transform_4, window_bounds = array<i64: 1, 8, 1>}, {transform_indices = @transform_5, window_bounds = array<i64: 1, 8, 1>}]} {
    %c0 = arith.constant 0 : index
    %c0_0 = arith.constant 0 : index
    %c0_1 = arith.constant 0 : index
    %0 = vector.load %arg1[%c0, %c0_0, %c0_1] : memref<1x8x256xf32, #tpu.memory_space<vmem>>, vector<1x8x256xf32>
    %1 = vector.shape_cast %0 : vector<1x8x256xf32> to vector<8x256xf32>
    %cst = arith.constant 0.000000e+00 : f32
    %2 = vector.broadcast %cst : f32 to vector<8x17xf32>
    %3 = tpu.concatenate %2, %1, %2 in 1 : vector<8x17xf32>, vector<8x256xf32>, vector<8x17xf32> -> vector<8x290xf32>
    %4 = tpu.iota {dimensions = array<i32: 1>} : vector<8x256xi32>
    %c16_i32 = arith.constant 16 : i32
    %c0_i32 = arith.constant 0 : i32
    %5 = arith.cmpi eq, %c16_i32, %c0_i32 : i32
    %c1_i32 = arith.constant 1 : i32
    %6 = arith.select %5, %c1_i32, %c16_i32 : i32
    %7 = vector.broadcast %6 : i32 to vector<8x256xi32>
    %8 = arith.remsi %4, %7 : vector<8x256xi32>
    %c0_i32_2 = arith.constant 0 : i32
    %9 = vector.broadcast %c0_i32_2 : i32 to vector<8x256xi32>
    %10 = arith.cmpi ne, %8, %9 : vector<8x256xi32>
    %c0_i32_3 = arith.constant 0 : i32
    %11 = vector.broadcast %c0_i32_3 : i32 to vector<8x256xi32>
    %12 = arith.cmpi slt, %8, %11 : vector<8x256xi32>
    %c0_i32_4 = arith.constant 0 : i32
    %13 = arith.cmpi slt, %6, %c0_i32_4 : i32
    %14 = vector.broadcast %13 : i1 to vector<8x256xi1>
    %15 = vector.broadcast %14 : vector<8x256xi1> to vector<8x256xi1>
    %16 = arith.xori %12, %15 : vector<8x256xi1>
    %17 = arith.andi %16, %10 : vector<8x256xi1>
    %18 = vector.broadcast %6 : i32 to vector<8x256xi32>
    %19 = arith.addi %8, %18 : vector<8x256xi32>
    %20 = arith.select %17, %19, %8 : vector<8x256xi1>, vector<8x256xi32>
    %c15_i32 = arith.constant 15 : i32
    %21 = vector.broadcast %c15_i32 : i32 to vector<8x256xi32>
    %22 = arith.cmpi ne, %20, %21 : vector<8x256xi32>
    %c0_i32_5 = arith.constant 0 : i32
    %23 = vector.broadcast %c0_i32_5 : i32 to vector<8x256xi32>
    %24 = arith.cmpi ne, %20, %23 : vector<8x256xi32>
    %25 = vector.extract_strided_slice %3 {offsets = [0, 0], sizes = [8, 256], strides = [1, 1]} : vector<8x290xf32> to vector<8x256xf32>
    %cst_6 = arith.constant 0.000000e+00 : f32
    %26 = vector.broadcast %cst_6 : f32 to vector<8x256xf32>
    %27 = arith.select %24, %25, %26 : vector<8x256xi1>, vector<8x256xf32>
    %c0_7 = arith.constant 0 : index
    %c0_8 = arith.constant 0 : index
    %28 = vector.load %arg7[%c0_7, %c0_8] : memref<72x256xf32, #tpu.memory_space<vmem>>, vector<8x256xf32>
    tpu.vector_store %arg7[%c0_7, %c0_8], %27 {strides = array<i32>} : memref<72x256xf32, #tpu.memory_space<vmem>>, vector<8x256xf32>,
    %29 = vector.extract_strided_slice %3 {offsets = [0, 1], sizes = [8, 256], strides = [1, 1]} : vector<8x290xf32> to vector<8x256xf32>
    %c8 = arith.constant 8 : index
    %c0_9 = arith.constant 0 : index
    %30 = vector.load %arg7[%c8, %c0_9] : memref<72x256xf32, #tpu.memory_space<vmem>>, vector<8x256xf32>
    tpu.vector_store %arg7[%c8, %c0_9], %29 {strides = array<i32>} : memref<72x256xf32, #tpu.memory_space<vmem>>, vector<8x256xf32>,
    %31 = vector.extract_strided_slice %3 {offsets = [0, 2], sizes = [8, 256], strides = [1, 1]} : vector<8x290xf32> to vector<8x256xf32>
    %cst_10 = arith.constant 0.000000e+00 : f32
    %32 = vector.broadcast %cst_10 : f32 to vector<8x256xf32>
    %33 = arith.select %22, %31, %32 : vector<8x256xi1>, vector<8x256xf32>
    %c16 = arith.constant 16 : index
    %c0_11 = arith.constant 0 : index
    %34 = vector.load %arg7[%c16, %c0_11] : memref<72x256xf32, #tpu.memory_space<vmem>>, vector<8x256xf32>
    tpu.vector_store %arg7[%c16, %c0_11], %33 {strides = array<i32>} : memref<72x256xf32, #tpu.memory_space<vmem>>, vector<8x256xf32>,
    %35 = vector.extract_strided_slice %3 {offsets = [0, 16], sizes = [8, 256], strides = [1, 1]} : vector<8x290xf32> to vector<8x256xf32>
    %cst_12 = arith.constant 0.000000e+00 : f32
    %36 = vector.broadcast %cst_12 : f32 to vector<8x256xf32>
    %37 = arith.select %24, %35, %36 : vector<8x256xi1>, vector<8x256xf32>
    %c24 = arith.constant 24 : index
    %c0_13 = arith.constant 0 : index
    %38 = vector.load %arg7[%c24, %c0_13] : memref<72x256xf32, #tpu.memory_space<vmem>>, vector<8x256xf32>
    tpu.vector_store %arg7[%c24, %c0_13], %37 {strides = array<i32>} : memref<72x256xf32, #tpu.memory_space<vmem>>, vector<8x256xf32>,
    %39 = vector.extract_strided_slice %3 {offsets = [0, 17], sizes = [8, 256], strides = [1, 1]} : vector<8x290xf32> to vector<8x256xf32>
    %c32 = arith.constant 32 : index
    %c0_14 = arith.constant 0 : index
    %40 = vector.load %arg7[%c32, %c0_14] : memref<72x256xf32, #tpu.memory_space<vmem>>, vector<8x256xf32>
    tpu.vector_store %arg7[%c32, %c0_14], %39 {strides = array<i32>} : memref<72x256xf32, #tpu.memory_space<vmem>>, vector<8x256xf32>,
    %41 = vector.extract_strided_slice %3 {offsets = [0, 18], sizes = [8, 256], strides = [1, 1]} : vector<8x290xf32> to vector<8x256xf32>
    %cst_15 = arith.constant 0.000000e+00 : f32
    %42 = vector.broadcast %cst_15 : f32 to vector<8x256xf32>
    %43 = arith.select %22, %41, %42 : vector<8x256xi1>, vector<8x256xf32>
    %c40 = arith.constant 40 : index
    %c0_16 = arith.constant 0 : index
    %44 = vector.load %arg7[%c40, %c0_16] : memref<72x256xf32, #tpu.memory_space<vmem>>, vector<8x256xf32>
    tpu.vector_store %arg7[%c40, %c0_16], %43 {strides = array<i32>} : memref<72x256xf32, #tpu.memory_space<vmem>>, vector<8x256xf32>,
    %45 = vector.extract_strided_slice %3 {offsets = [0, 32], sizes = [8, 256], strides = [1, 1]} : vector<8x290xf32> to vector<8x256xf32>
    %cst_17 = arith.constant 0.000000e+00 : f32
    %46 = vector.broadcast %cst_17 : f32 to vector<8x256xf32>
    %47 = arith.select %24, %45, %46 : vector<8x256xi1>, vector<8x256xf32>
    %c48 = arith.constant 48 : index
    %c0_18 = arith.constant 0 : index
    %48 = vector.load %arg7[%c48, %c0_18] : memref<72x256xf32, #tpu.memory_space<vmem>>, vector<8x256xf32>
    tpu.vector_store %arg7[%c48, %c0_18], %47 {strides = array<i32>} : memref<72x256xf32, #tpu.memory_space<vmem>>, vector<8x256xf32>,
    %49 = vector.extract_strided_slice %3 {offsets = [0, 33], sizes = [8, 256], strides = [1, 1]} : vector<8x290xf32> to vector<8x256xf32>
    %c56 = arith.constant 56 : index
    %c0_19 = arith.constant 0 : index
    %50 = vector.load %arg7[%c56, %c0_19] : memref<72x256xf32, #tpu.memory_space<vmem>>, vector<8x256xf32>
    tpu.vector_store %arg7[%c56, %c0_19], %49 {strides = array<i32>} : memref<72x256xf32, #tpu.memory_space<vmem>>, vector<8x256xf32>,
    %51 = vector.extract_strided_slice %3 {offsets = [0, 34], sizes = [8, 256], strides = [1, 1]} : vector<8x290xf32> to vector<8x256xf32>
    %cst_20 = arith.constant 0.000000e+00 : f32
    %52 = vector.broadcast %cst_20 : f32 to vector<8x256xf32>
    %53 = arith.select %22, %51, %52 : vector<8x256xi1>, vector<8x256xf32>
    %c64 = arith.constant 64 : index
    %c0_21 = arith.constant 0 : index
    %54 = vector.load %arg7[%c64, %c0_21] : memref<72x256xf32, #tpu.memory_space<vmem>>, vector<8x256xf32>
    tpu.vector_store %arg7[%c64, %c0_21], %53 {strides = array<i32>} : memref<72x256xf32, #tpu.memory_space<vmem>>, vector<8x256xf32>,
    %c0_22 = arith.constant 0 : index
    %c0_23 = arith.constant 0 : index
    %55 = vector.load %arg2[%c0_22, %c0_23] : memref<8x72xbf16, #tpu.memory_space<vmem>>, vector<8x72xbf16>
    %c0_24 = arith.constant 0 : index
    %c0_25 = arith.constant 0 : index
    %56 = vector.load %arg7[%c0_24, %c0_25] : memref<72x256xf32, #tpu.memory_space<vmem>>, vector<72x256xf32>
    %57 = arith.truncf %56 : vector<72x256xf32> to vector<72x256xbf16>
    %cst_26 = arith.constant dense<0.000000e+00> : vector<8x256xf32>
    %58 = tpu.matmul %55, %57, %cst_26 {dimension_numbers = #tpu.dot_dimension_numbers<[1], [0], [0], [1], [0, 0, 1, 1], [], []>} : vector<8x72xbf16>, vector<72x256xbf16>, vector<8x256xf32> -> vector<8x256xf32>
    %c0_27 = arith.constant 0 : index
    %c0_28 = arith.constant 0 : index
    %59 = vector.load %arg3[%c0_27, %c0_28] : memref<8x1xf32, #tpu.memory_space<vmem>>, vector<8x1xf32>
    %60 = vector.broadcast %59 : vector<8x1xf32> to vector<8x256xf32>
    %61 = arith.addf %58, %60 : vector<8x256xf32>
    %cst_29 = arith.constant dense<0.000000e+00> : vector<8xf32>
    %62 = vector.multi_reduction <add>, %61, %cst_29 [1] : vector<8x256xf32> to vector<8xf32>
    %63 = vector.shape_cast %62 : vector<8xf32> to vector<8x1xf32>
    %c0_30 = arith.constant 0 : index
    %c0_31 = arith.constant 0 : index
    %c0_32 = arith.constant 0 : index
    %64 = vector.load %arg5[%c0_30, %c0_31, %c0_32] : memref<1x8x1xf32, #tpu.memory_space<vmem>>, vector<1x8x1xf32>
    %65 = vector.shape_cast %64 : vector<1x8x1xf32> to vector<8x1xf32>
    %66 = vector.shape_cast %63 : vector<8x1xf32> to vector<1x8x1xf32>
    tpu.vector_store %arg5[%c0_30, %c0_31, %c0_32], %66 {strides = array<i32>} : memref<1x8x1xf32, #tpu.memory_space<vmem>>, vector<1x8x1xf32>,
    %67 = arith.mulf %61, %61 : vector<8x256xf32>
    %cst_33 = arith.constant dense<0.000000e+00> : vector<8xf32>
    %68 = vector.multi_reduction <add>, %67, %cst_33 [1] : vector<8x256xf32> to vector<8xf32>
    %69 = vector.shape_cast %68 : vector<8xf32> to vector<8x1xf32>
    %c0_34 = arith.constant 0 : index
    %c0_35 = arith.constant 0 : index
    %c0_36 = arith.constant 0 : index
    %70 = vector.load %arg6[%c0_34, %c0_35, %c0_36] : memref<1x8x1xf32, #tpu.memory_space<vmem>>, vector<1x8x1xf32>
    %71 = vector.shape_cast %70 : vector<1x8x1xf32> to vector<8x1xf32>
    %72 = vector.shape_cast %69 : vector<8x1xf32> to vector<1x8x1xf32>
    tpu.vector_store %arg6[%c0_34, %c0_35, %c0_36], %72 {strides = array<i32>} : memref<1x8x1xf32, #tpu.memory_space<vmem>>, vector<1x8x1xf32>,
    %c0_37 = arith.constant 0 : index
    %c0_38 = arith.constant 0 : index
    %c0_39 = arith.constant 0 : index
    %73 = vector.load %arg4[%c0_37, %c0_38, %c0_39] : memref<1x8x256xf32, #tpu.memory_space<vmem>>, vector<1x8x256xf32>
    %74 = vector.shape_cast %73 : vector<1x8x256xf32> to vector<8x256xf32>
    %75 = vector.shape_cast %61 : vector<8x256xf32> to vector<1x8x256xf32>
    tpu.vector_store %arg4[%c0_37, %c0_38, %c0_39], %75 {strides = array<i32>} : memref<1x8x256xf32, #tpu.memory_space<vmem>>, vector<1x8x256xf32>,
    return
  }
  func.func @transform_0(%arg0: i32) -> (i32, i32, i32) {
    %c0_i32 = arith.constant 0 : i32
    %c0_i32_0 = arith.constant 0 : i32
    %c0_i32_1 = arith.constant 0 : i32
    return %arg0, %c0_i32, %c0_i32_0 : i32, i32, i32
  }
  func.func @transform_1(%arg0: i32) -> (i32, i32) {
    %c0_i32 = arith.constant 0 : i32
    %c0_i32_0 = arith.constant 0 : i32
    %c0_i32_1 = arith.constant 0 : i32
    return %c0_i32, %c0_i32_0 : i32, i32
  }
  func.func @transform_2(%arg0: i32) -> (i32, i32) {
    %c0_i32 = arith.constant 0 : i32
    %c0_i32_0 = arith.constant 0 : i32
    %c0_i32_1 = arith.constant 0 : i32
    return %c0_i32, %c0_i32_0 : i32, i32
  }
  func.func @transform_3(%arg0: i32) -> (i32, i32, i32) {
    %c0_i32 = arith.constant 0 : i32
    %c0_i32_0 = arith.constant 0 : i32
    %c0_i32_1 = arith.constant 0 : i32
    return %arg0, %c0_i32, %c0_i32_0 : i32, i32, i32
  }
  func.func @transform_4(%arg0: i32) -> (i32, i32, i32) {
    %c0_i32 = arith.constant 0 : i32
    %c0_i32_0 = arith.constant 0 : i32
    %c0_i32_1 = arith.constant 0 : i32
    return %arg0, %c0_i32, %c0_i32_0 : i32, i32, i32
  }
  func.func @transform_5(%arg0: i32) -> (i32, i32, i32) {
    %c0_i32 = arith.constant 0 : i32
    %c0_i32_0 = arith.constant 0 : i32
    %c0_i32_1 = arith.constant 0 : i32
    return %arg0, %c0_i32, %c0_i32_0 : i32, i32, i32
  }
}

module attributes {stable_mosaic.version = 11 : i64} {
  func.func @_conv2_kernel(%arg0: i32, %arg1: memref<1x8x256xf32, #tpu.memory_space<vmem>>, %arg2: memref<8x1xf32, #tpu.memory_space<vmem>>, %arg3: memref<8x1xf32, #tpu.memory_space<vmem>>, %arg4: memref<4x72xbf16, #tpu.memory_space<vmem>>, %arg5: memref<4x1xf32, #tpu.memory_space<vmem>>, %arg6: memref<1x4x256xf32, #tpu.memory_space<vmem>>, %arg7: memref<1x4x1xf32, #tpu.memory_space<vmem>>, %arg8: memref<1x4x1xf32, #tpu.memory_space<vmem>>, %arg9: memref<72x256xf32, #tpu.memory_space<vmem>>) attributes {dimension_semantics = [#tpu.dimension_semantics<parallel>], iteration_bounds = array<i64: 2>, scalar_prefetch = 0 : i64, scratch_operands = 1 : i64, tpu.core_type = #tpu.core_type<tc>, window_params = [{transform_indices = @transform_0, window_bounds = array<i64: 1, 8, 256>}, {pipeline_mode = #tpu.pipeline_mode<synchronous>, transform_indices = @transform_1, window_bounds = array<i64: 8, 1>}, {pipeline_mode = #tpu.pipeline_mode<synchronous>, transform_indices = @transform_2, window_bounds = array<i64: 8, 1>}, {pipeline_mode = #tpu.pipeline_mode<synchronous>, transform_indices = @transform_3, window_bounds = array<i64: 4, 72>}, {pipeline_mode = #tpu.pipeline_mode<synchronous>, transform_indices = @transform_4, window_bounds = array<i64: 4, 1>}, {transform_indices = @transform_5, window_bounds = array<i64: 1, 4, 256>}, {transform_indices = @transform_6, window_bounds = array<i64: 1, 4, 1>}, {transform_indices = @transform_7, window_bounds = array<i64: 1, 4, 1>}]} {
    %c0 = arith.constant 0 : index
    %c0_0 = arith.constant 0 : index
    %c0_1 = arith.constant 0 : index
    %0 = vector.load %arg1[%c0, %c0_0, %c0_1] : memref<1x8x256xf32, #tpu.memory_space<vmem>>, vector<1x8x256xf32>
    %1 = vector.shape_cast %0 : vector<1x8x256xf32> to vector<8x256xf32>
    %c0_2 = arith.constant 0 : index
    %c0_3 = arith.constant 0 : index
    %2 = vector.load %arg2[%c0_2, %c0_3] : memref<8x1xf32, #tpu.memory_space<vmem>>, vector<8x1xf32>
    %3 = vector.broadcast %2 : vector<8x1xf32> to vector<8x256xf32>
    %4 = arith.mulf %1, %3 : vector<8x256xf32>
    %c0_4 = arith.constant 0 : index
    %c0_5 = arith.constant 0 : index
    %5 = vector.load %arg3[%c0_4, %c0_5] : memref<8x1xf32, #tpu.memory_space<vmem>>, vector<8x1xf32>
    %6 = vector.broadcast %5 : vector<8x1xf32> to vector<8x256xf32>
    %7 = arith.addf %4, %6 : vector<8x256xf32>
    %cst = arith.constant 0.000000e+00 : f32
    %8 = vector.broadcast %cst : f32 to vector<8x256xf32>
    %9 = arith.maximumf %7, %8 : vector<8x256xf32>
    %cst_6 = arith.constant 0.000000e+00 : f32
    %10 = vector.broadcast %cst_6 : f32 to vector<8x17xf32>
    %11 = tpu.concatenate %10, %9, %10 in 1 : vector<8x17xf32>, vector<8x256xf32>, vector<8x17xf32> -> vector<8x290xf32>
    %12 = tpu.iota {dimensions = array<i32: 1>} : vector<8x256xi32>
    %c16_i32 = arith.constant 16 : i32
    %c0_i32 = arith.constant 0 : i32
    %13 = arith.cmpi eq, %c16_i32, %c0_i32 : i32
    %c1_i32 = arith.constant 1 : i32
    %14 = arith.select %13, %c1_i32, %c16_i32 : i32
    %15 = vector.broadcast %14 : i32 to vector<8x256xi32>
    %16 = arith.remsi %12, %15 : vector<8x256xi32>
    %c0_i32_7 = arith.constant 0 : i32
    %17 = vector.broadcast %c0_i32_7 : i32 to vector<8x256xi32>
    %18 = arith.cmpi ne, %16, %17 : vector<8x256xi32>
    %c0_i32_8 = arith.constant 0 : i32
    %19 = vector.broadcast %c0_i32_8 : i32 to vector<8x256xi32>
    %20 = arith.cmpi slt, %16, %19 : vector<8x256xi32>
    %c0_i32_9 = arith.constant 0 : i32
    %21 = arith.cmpi slt, %14, %c0_i32_9 : i32
    %22 = vector.broadcast %21 : i1 to vector<8x256xi1>
    %23 = vector.broadcast %22 : vector<8x256xi1> to vector<8x256xi1>
    %24 = arith.xori %20, %23 : vector<8x256xi1>
    %25 = arith.andi %24, %18 : vector<8x256xi1>
    %26 = vector.broadcast %14 : i32 to vector<8x256xi32>
    %27 = arith.addi %16, %26 : vector<8x256xi32>
    %28 = arith.select %25, %27, %16 : vector<8x256xi1>, vector<8x256xi32>
    %c15_i32 = arith.constant 15 : i32
    %29 = vector.broadcast %c15_i32 : i32 to vector<8x256xi32>
    %30 = arith.cmpi ne, %28, %29 : vector<8x256xi32>
    %c0_i32_10 = arith.constant 0 : i32
    %31 = vector.broadcast %c0_i32_10 : i32 to vector<8x256xi32>
    %32 = arith.cmpi ne, %28, %31 : vector<8x256xi32>
    %33 = vector.extract_strided_slice %11 {offsets = [0, 0], sizes = [8, 256], strides = [1, 1]} : vector<8x290xf32> to vector<8x256xf32>
    %cst_11 = arith.constant 0.000000e+00 : f32
    %34 = vector.broadcast %cst_11 : f32 to vector<8x256xf32>
    %35 = arith.select %32, %33, %34 : vector<8x256xi1>, vector<8x256xf32>
    %c0_12 = arith.constant 0 : index
    %c0_13 = arith.constant 0 : index
    %36 = vector.load %arg9[%c0_12, %c0_13] : memref<72x256xf32, #tpu.memory_space<vmem>>, vector<8x256xf32>
    tpu.vector_store %arg9[%c0_12, %c0_13], %35 {strides = array<i32>} : memref<72x256xf32, #tpu.memory_space<vmem>>, vector<8x256xf32>,
    %37 = vector.extract_strided_slice %11 {offsets = [0, 1], sizes = [8, 256], strides = [1, 1]} : vector<8x290xf32> to vector<8x256xf32>
    %c8 = arith.constant 8 : index
    %c0_14 = arith.constant 0 : index
    %38 = vector.load %arg9[%c8, %c0_14] : memref<72x256xf32, #tpu.memory_space<vmem>>, vector<8x256xf32>
    tpu.vector_store %arg9[%c8, %c0_14], %37 {strides = array<i32>} : memref<72x256xf32, #tpu.memory_space<vmem>>, vector<8x256xf32>,
    %39 = vector.extract_strided_slice %11 {offsets = [0, 2], sizes = [8, 256], strides = [1, 1]} : vector<8x290xf32> to vector<8x256xf32>
    %cst_15 = arith.constant 0.000000e+00 : f32
    %40 = vector.broadcast %cst_15 : f32 to vector<8x256xf32>
    %41 = arith.select %30, %39, %40 : vector<8x256xi1>, vector<8x256xf32>
    %c16 = arith.constant 16 : index
    %c0_16 = arith.constant 0 : index
    %42 = vector.load %arg9[%c16, %c0_16] : memref<72x256xf32, #tpu.memory_space<vmem>>, vector<8x256xf32>
    tpu.vector_store %arg9[%c16, %c0_16], %41 {strides = array<i32>} : memref<72x256xf32, #tpu.memory_space<vmem>>, vector<8x256xf32>,
    %43 = vector.extract_strided_slice %11 {offsets = [0, 16], sizes = [8, 256], strides = [1, 1]} : vector<8x290xf32> to vector<8x256xf32>
    %cst_17 = arith.constant 0.000000e+00 : f32
    %44 = vector.broadcast %cst_17 : f32 to vector<8x256xf32>
    %45 = arith.select %32, %43, %44 : vector<8x256xi1>, vector<8x256xf32>
    %c24 = arith.constant 24 : index
    %c0_18 = arith.constant 0 : index
    %46 = vector.load %arg9[%c24, %c0_18] : memref<72x256xf32, #tpu.memory_space<vmem>>, vector<8x256xf32>
    tpu.vector_store %arg9[%c24, %c0_18], %45 {strides = array<i32>} : memref<72x256xf32, #tpu.memory_space<vmem>>, vector<8x256xf32>,
    %47 = vector.extract_strided_slice %11 {offsets = [0, 17], sizes = [8, 256], strides = [1, 1]} : vector<8x290xf32> to vector<8x256xf32>
    %c32 = arith.constant 32 : index
    %c0_19 = arith.constant 0 : index
    %48 = vector.load %arg9[%c32, %c0_19] : memref<72x256xf32, #tpu.memory_space<vmem>>, vector<8x256xf32>
    tpu.vector_store %arg9[%c32, %c0_19], %47 {strides = array<i32>} : memref<72x256xf32, #tpu.memory_space<vmem>>, vector<8x256xf32>,
    %49 = vector.extract_strided_slice %11 {offsets = [0, 18], sizes = [8, 256], strides = [1, 1]} : vector<8x290xf32> to vector<8x256xf32>
    %cst_20 = arith.constant 0.000000e+00 : f32
    %50 = vector.broadcast %cst_20 : f32 to vector<8x256xf32>
    %51 = arith.select %30, %49, %50 : vector<8x256xi1>, vector<8x256xf32>
    %c40 = arith.constant 40 : index
    %c0_21 = arith.constant 0 : index
    %52 = vector.load %arg9[%c40, %c0_21] : memref<72x256xf32, #tpu.memory_space<vmem>>, vector<8x256xf32>
    tpu.vector_store %arg9[%c40, %c0_21], %51 {strides = array<i32>} : memref<72x256xf32, #tpu.memory_space<vmem>>, vector<8x256xf32>,
    %53 = vector.extract_strided_slice %11 {offsets = [0, 32], sizes = [8, 256], strides = [1, 1]} : vector<8x290xf32> to vector<8x256xf32>
    %cst_22 = arith.constant 0.000000e+00 : f32
    %54 = vector.broadcast %cst_22 : f32 to vector<8x256xf32>
    %55 = arith.select %32, %53, %54 : vector<8x256xi1>, vector<8x256xf32>
    %c48 = arith.constant 48 : index
    %c0_23 = arith.constant 0 : index
    %56 = vector.load %arg9[%c48, %c0_23] : memref<72x256xf32, #tpu.memory_space<vmem>>, vector<8x256xf32>
    tpu.vector_store %arg9[%c48, %c0_23], %55 {strides = array<i32>} : memref<72x256xf32, #tpu.memory_space<vmem>>, vector<8x256xf32>,
    %57 = vector.extract_strided_slice %11 {offsets = [0, 33], sizes = [8, 256], strides = [1, 1]} : vector<8x290xf32> to vector<8x256xf32>
    %c56 = arith.constant 56 : index
    %c0_24 = arith.constant 0 : index
    %58 = vector.load %arg9[%c56, %c0_24] : memref<72x256xf32, #tpu.memory_space<vmem>>, vector<8x256xf32>
    tpu.vector_store %arg9[%c56, %c0_24], %57 {strides = array<i32>} : memref<72x256xf32, #tpu.memory_space<vmem>>, vector<8x256xf32>,
    %59 = vector.extract_strided_slice %11 {offsets = [0, 34], sizes = [8, 256], strides = [1, 1]} : vector<8x290xf32> to vector<8x256xf32>
    %cst_25 = arith.constant 0.000000e+00 : f32
    %60 = vector.broadcast %cst_25 : f32 to vector<8x256xf32>
    %61 = arith.select %30, %59, %60 : vector<8x256xi1>, vector<8x256xf32>
    %c64 = arith.constant 64 : index
    %c0_26 = arith.constant 0 : index
    %62 = vector.load %arg9[%c64, %c0_26] : memref<72x256xf32, #tpu.memory_space<vmem>>, vector<8x256xf32>
    tpu.vector_store %arg9[%c64, %c0_26], %61 {strides = array<i32>} : memref<72x256xf32, #tpu.memory_space<vmem>>, vector<8x256xf32>,
    %c0_27 = arith.constant 0 : index
    %c0_28 = arith.constant 0 : index
    %63 = vector.load %arg4[%c0_27, %c0_28] : memref<4x72xbf16, #tpu.memory_space<vmem>>, vector<4x72xbf16>
    %c0_29 = arith.constant 0 : index
    %c0_30 = arith.constant 0 : index
    %64 = vector.load %arg9[%c0_29, %c0_30] : memref<72x256xf32, #tpu.memory_space<vmem>>, vector<72x256xf32>
    %65 = arith.truncf %64 : vector<72x256xf32> to vector<72x256xbf16>
    %cst_31 = arith.constant dense<0.000000e+00> : vector<4x256xf32>
    %66 = tpu.matmul %63, %65, %cst_31 {dimension_numbers = #tpu.dot_dimension_numbers<[1], [0], [0], [1], [0, 0, 1, 1], [], []>} : vector<4x72xbf16>, vector<72x256xbf16>, vector<4x256xf32> -> vector<4x256xf32>
    %c0_32 = arith.constant 0 : index
    %c0_33 = arith.constant 0 : index
    %67 = vector.load %arg5[%c0_32, %c0_33] : memref<4x1xf32, #tpu.memory_space<vmem>>, vector<4x1xf32>
    %68 = vector.broadcast %67 : vector<4x1xf32> to vector<4x256xf32>
    %69 = arith.addf %66, %68 : vector<4x256xf32>
    %cst_34 = arith.constant dense<0.000000e+00> : vector<4xf32>
    %70 = vector.multi_reduction <add>, %69, %cst_34 [1] : vector<4x256xf32> to vector<4xf32>
    %71 = vector.shape_cast %70 : vector<4xf32> to vector<4x1xf32>
    %c0_35 = arith.constant 0 : index
    %c0_36 = arith.constant 0 : index
    %c0_37 = arith.constant 0 : index
    %72 = vector.load %arg7[%c0_35, %c0_36, %c0_37] : memref<1x4x1xf32, #tpu.memory_space<vmem>>, vector<1x4x1xf32>
    %73 = vector.shape_cast %72 : vector<1x4x1xf32> to vector<4x1xf32>
    %74 = vector.shape_cast %71 : vector<4x1xf32> to vector<1x4x1xf32>
    tpu.vector_store %arg7[%c0_35, %c0_36, %c0_37], %74 {strides = array<i32>} : memref<1x4x1xf32, #tpu.memory_space<vmem>>, vector<1x4x1xf32>,
    %75 = arith.mulf %69, %69 : vector<4x256xf32>
    %cst_38 = arith.constant dense<0.000000e+00> : vector<4xf32>
    %76 = vector.multi_reduction <add>, %75, %cst_38 [1] : vector<4x256xf32> to vector<4xf32>
    %77 = vector.shape_cast %76 : vector<4xf32> to vector<4x1xf32>
    %c0_39 = arith.constant 0 : index
    %c0_40 = arith.constant 0 : index
    %c0_41 = arith.constant 0 : index
    %78 = vector.load %arg8[%c0_39, %c0_40, %c0_41] : memref<1x4x1xf32, #tpu.memory_space<vmem>>, vector<1x4x1xf32>
    %79 = vector.shape_cast %78 : vector<1x4x1xf32> to vector<4x1xf32>
    %80 = vector.shape_cast %77 : vector<4x1xf32> to vector<1x4x1xf32>
    tpu.vector_store %arg8[%c0_39, %c0_40, %c0_41], %80 {strides = array<i32>} : memref<1x4x1xf32, #tpu.memory_space<vmem>>, vector<1x4x1xf32>,
    %c0_42 = arith.constant 0 : index
    %c0_43 = arith.constant 0 : index
    %c0_44 = arith.constant 0 : index
    %81 = vector.load %arg6[%c0_42, %c0_43, %c0_44] : memref<1x4x256xf32, #tpu.memory_space<vmem>>, vector<1x4x256xf32>
    %82 = vector.shape_cast %81 : vector<1x4x256xf32> to vector<4x256xf32>
    %83 = vector.shape_cast %69 : vector<4x256xf32> to vector<1x4x256xf32>
    tpu.vector_store %arg6[%c0_42, %c0_43, %c0_44], %83 {strides = array<i32>} : memref<1x4x256xf32, #tpu.memory_space<vmem>>, vector<1x4x256xf32>,
    return
  }
  func.func @transform_0(%arg0: i32) -> (i32, i32, i32) {
    %c0_i32 = arith.constant 0 : i32
    %c0_i32_0 = arith.constant 0 : i32
    %c0_i32_1 = arith.constant 0 : i32
    return %arg0, %c0_i32, %c0_i32_0 : i32, i32, i32
  }
  func.func @transform_1(%arg0: i32) -> (i32, i32) {
    %c0_i32 = arith.constant 0 : i32
    %c0_i32_0 = arith.constant 0 : i32
    %c0_i32_1 = arith.constant 0 : i32
    return %c0_i32, %c0_i32_0 : i32, i32
  }
  func.func @transform_2(%arg0: i32) -> (i32, i32) {
    %c0_i32 = arith.constant 0 : i32
    %c0_i32_0 = arith.constant 0 : i32
    %c0_i32_1 = arith.constant 0 : i32
    return %c0_i32, %c0_i32_0 : i32, i32
  }
  func.func @transform_3(%arg0: i32) -> (i32, i32) {
    %c0_i32 = arith.constant 0 : i32
    %c0_i32_0 = arith.constant 0 : i32
    %c0_i32_1 = arith.constant 0 : i32
    return %c0_i32, %c0_i32_0 : i32, i32
  }
  func.func @transform_4(%arg0: i32) -> (i32, i32) {
    %c0_i32 = arith.constant 0 : i32
    %c0_i32_0 = arith.constant 0 : i32
    %c0_i32_1 = arith.constant 0 : i32
    return %c0_i32, %c0_i32_0 : i32, i32
  }
  func.func @transform_5(%arg0: i32) -> (i32, i32, i32) {
    %c0_i32 = arith.constant 0 : i32
    %c0_i32_0 = arith.constant 0 : i32
    %c0_i32_1 = arith.constant 0 : i32
    return %arg0, %c0_i32, %c0_i32_0 : i32, i32, i32
  }
  func.func @transform_6(%arg0: i32) -> (i32, i32, i32) {
    %c0_i32 = arith.constant 0 : i32
    %c0_i32_0 = arith.constant 0 : i32
    %c0_i32_1 = arith.constant 0 : i32
    return %arg0, %c0_i32, %c0_i32_0 : i32, i32, i32
  }
  func.func @transform_7(%arg0: i32) -> (i32, i32, i32) {
    %c0_i32 = arith.constant 0 : i32
    %c0_i32_0 = arith.constant 0 : i32
    %c0_i32_1 = arith.constant 0 : i32
    return %arg0, %c0_i32, %c0_i32_0 : i32, i32, i32
  }
}

module attributes {stable_mosaic.version = 11 : i64} {
  func.func @_bn_relu_kernel(%arg0: i32, %arg1: memref<1x4x256xf32, #tpu.memory_space<vmem>>, %arg2: memref<4x1xf32, #tpu.memory_space<vmem>>, %arg3: memref<4x1xf32, #tpu.memory_space<vmem>>, %arg4: memref<1x4x256xf32, #tpu.memory_space<vmem>>) attributes {dimension_semantics = [#tpu.dimension_semantics<parallel>], iteration_bounds = array<i64: 2>, scalar_prefetch = 0 : i64, scratch_operands = 0 : i64, tpu.core_type = #tpu.core_type<tc>, window_params = [{transform_indices = @transform_0, window_bounds = array<i64: 1, 4, 256>}, {pipeline_mode = #tpu.pipeline_mode<synchronous>, transform_indices = @transform_1, window_bounds = array<i64: 4, 1>}, {pipeline_mode = #tpu.pipeline_mode<synchronous>, transform_indices = @transform_2, window_bounds = array<i64: 4, 1>}, {transform_indices = @transform_3, window_bounds = array<i64: 1, 4, 256>}]} {
    %c0 = arith.constant 0 : index
    %c0_0 = arith.constant 0 : index
    %c0_1 = arith.constant 0 : index
    %0 = vector.load %arg1[%c0, %c0_0, %c0_1] : memref<1x4x256xf32, #tpu.memory_space<vmem>>, vector<1x4x256xf32>
    %1 = vector.shape_cast %0 : vector<1x4x256xf32> to vector<4x256xf32>
    %c0_2 = arith.constant 0 : index
    %c0_3 = arith.constant 0 : index
    %2 = vector.load %arg2[%c0_2, %c0_3] : memref<4x1xf32, #tpu.memory_space<vmem>>, vector<4x1xf32>
    %3 = vector.broadcast %2 : vector<4x1xf32> to vector<4x256xf32>
    %4 = arith.mulf %1, %3 : vector<4x256xf32>
    %c0_4 = arith.constant 0 : index
    %c0_5 = arith.constant 0 : index
    %5 = vector.load %arg3[%c0_4, %c0_5] : memref<4x1xf32, #tpu.memory_space<vmem>>, vector<4x1xf32>
    %6 = vector.broadcast %5 : vector<4x1xf32> to vector<4x256xf32>
    %7 = arith.addf %4, %6 : vector<4x256xf32>
    %cst = arith.constant 0.000000e+00 : f32
    %8 = vector.broadcast %cst : f32 to vector<4x256xf32>
    %9 = arith.maximumf %7, %8 : vector<4x256xf32>
    %c0_6 = arith.constant 0 : index
    %c0_7 = arith.constant 0 : index
    %c0_8 = arith.constant 0 : index
    %10 = vector.load %arg4[%c0_6, %c0_7, %c0_8] : memref<1x4x256xf32, #tpu.memory_space<vmem>>, vector<1x4x256xf32>
    %11 = vector.shape_cast %10 : vector<1x4x256xf32> to vector<4x256xf32>
    %12 = vector.shape_cast %9 : vector<4x256xf32> to vector<1x4x256xf32>
    tpu.vector_store %arg4[%c0_6, %c0_7, %c0_8], %12 {strides = array<i32>} : memref<1x4x256xf32, #tpu.memory_space<vmem>>, vector<1x4x256xf32>,
    return
  }
  func.func @transform_0(%arg0: i32) -> (i32, i32, i32) {
    %c0_i32 = arith.constant 0 : i32
    %c0_i32_0 = arith.constant 0 : i32
    %c0_i32_1 = arith.constant 0 : i32
    return %arg0, %c0_i32, %c0_i32_0 : i32, i32, i32
  }
  func.func @transform_1(%arg0: i32) -> (i32, i32) {
    %c0_i32 = arith.constant 0 : i32
    %c0_i32_0 = arith.constant 0 : i32
    %c0_i32_1 = arith.constant 0 : i32
    return %c0_i32, %c0_i32_0 : i32, i32
  }
  func.func @transform_2(%arg0: i32) -> (i32, i32) {
    %c0_i32 = arith.constant 0 : i32
    %c0_i32_0 = arith.constant 0 : i32
    %c0_i32_1 = arith.constant 0 : i32
    return %c0_i32, %c0_i32_0 : i32, i32
  }
  func.func @transform_3(%arg0: i32) -> (i32, i32, i32) {
    %c0_i32 = arith.constant 0 : i32
    %c0_i32_0 = arith.constant 0 : i32
    %c0_i32_1 = arith.constant 0 : i32
    return %arg0, %c0_i32, %c0_i32_0 : i32, i32, i32
  }
}

</mosaic_0001>

<bundles_post_ra>
// kernel: decoder_forward.5
= control target key start
LH: loop header
LB: loop body
LE: loop exit
PB: predicated region body
PF: predicated region fallthrough
CT: control target
= control target key end

     0   :  { %s311_s12 = smov 0   ;;  %s334_s0 = inlined_call_operand.vmem [shape: f32[2,4,256], index: 0, kind: input, shape index: {}]   ;;  %s335_s1 = inlined_call_operand.vmem [shape: f32[4,1], index: 1, kind: input, shape index: {}]   ;;  %s336_s2 = inlined_call_operand.vmem [shape: f32[4,1], index: 2, kind: input, shape index: {}]   ;;  %s337_s3 = inlined_call_operand.vmem [shape: f32[2,4,256], index: 3, kind: output, shape index: {}]  }
   0x1 LB: > { %s257_s13 = sadd.s32 4294967295, %s287_s12   ;;  %p261_p0 = scmp.ge.s32.totalorder %s287_s12, 1  ;;  %s287_s12 = sphi %s311_s12, %s13_s12  }
   0x2   : > { %p137_p1 = scmp.lt.s32.totalorder %s287_s12, 3 }
   0x4   : > { %p138_p2 = pnand %p261_p0, %p137_p1 }
   0x5   : > { %p161_p3 = scmp.lt.s32.totalorder (!%p138_p2), %s257_s13, 1 }
   0x6   : > { %141 = sbr.rel (%p138_p2) target bundleno = 148 (0x94), region = 32 }
   0xb   : > { %v172_v0 = vld [vmem:[%s335_s1] sm:$0xf]  ;;  %v289_v1 = vmov 0   ;;  %v290_v3 = vmov 839922192   ;;  %v180_v5 = vlaneseq  ;;  %s339_s13 = smov (!%p161_p3, %s257_s13), 1 }
   0xc   : > { %280 = vset.pattern.permute.xlu0 %v289_v1  ;;  %v186_v2 = vld [vmem:[%s336_s2] sm:$0xf]  ;;  %v178_v4 = vunpack.c.l.s4 %v290_v3  ;;  %s268_s18 = sshll.u32 %s339_s13, 3 }
   0xd   : > { %175 = vperm.xlu0 %280, %v172_v0   ;;  %v181_v7 = vshrl.u32 %v180_v5, 7  ;;  %s165_s21 = scalar_lea.vmem %s334_s0, %s268_s18  ;;  %s170_s24 = scalar_lea.vmem %s337_s3, %s268_s18 }
   0xe   : > { %v179_v6 = vunpack.c.0.s8 %v178_v4  ;;  %v171_v11 = vld [vmem:[%s165_s21] sm:$0xff] }
  0x10   : > { %v182_v8 = vsub.s32 %v179_v6, %v181_v7 }
  0x11   : > { %189 = vperm.xlu0 %280, %v186_v2  }
  0x88   : > { %v176_v9 = vpop.permute.xlu0 %175 }
  0x89   : > { %v183_v10 = vrot.slane %v176_v9, %v182_v8 }
  0x8b   : > { %v185_v13 = vmul.f32 %v183_v10, %v171_v11 }
  0x8c   : > { %v190_v12 = vpop.permute.xlu0 %189 }
  0x8d   : > { %v197_v14 = vrot.slane %v190_v12, %v182_v8 }
  0x8f   : > { %v199_v15 = vadd.f32 %v197_v14, %v185_v13 }
  0x91   : > { %v200_v16 = vmax.f32 %v199_v15, 0.0 }
  0x93   : > { %201 = vst [vmem:[%s170_s24] sm:$0xff] %v200_v16 }
  0x94 PF: > { %s13_s12 = sadd.s32 1, %s287_s12  }
  0x95   : > { %p10_p4 = scmp.ge.s32.totalorder %s13_s12, 4  }
  0x97   :  { %12 = sbr.rel (!%p10_p4) target bundleno = 1 (0x1), region = 62 }

// kernel: decoder_forward.3
= control target key start
LH: loop header
LB: loop body
LE: loop exit
PB: predicated region body
PF: predicated region fallthrough
CT: control target
= control target key end

     0   :  { %s786_s18 = smov 0   ;;  %s901_s0 = inlined_call_operand.vmem [shape: f32[2,8,256], index: 0, kind: input, shape index: {}]   ;;  %s902_s1 = inlined_call_operand.vmem [shape: bf16[8,72], index: 1, kind: input, shape index: {}]   ;;  %s903_s2 = inlined_call_operand.vmem [shape: f32[8,1], index: 2, kind: input, shape index: {}]   ;;  %s904_s3 = inlined_call_operand.vmem [shape: f32[2,8,256], index: 3, kind: output, shape index: {0}]   ;;  %s905_s4 = inlined_call_operand.vmem [shape: f32[2,8,1], index: 4, kind: output, shape index: {1}]   ;;  %s906_s5 = inlined_call_operand.vmem [shape: f32[2,8,1], index: 5, kind: output, shape index: {2}]  }
   0x1 LB: > { %s630_s19 = sadd.s32 4294967295, %s743_s18   ;;  %p634_p0 = scmp.ge.s32.totalorder %s743_s18, 1  ;;  %s743_s18 = sphi %s786_s18, %s16_s18  }
   0x2   : > { %p192_p1 = scmp.lt.s32.totalorder %s743_s18, 3 }
   0x4   : > { %p193_p2 = pnand %p634_p0, %p192_p1 }
   0x5   : > { %p228_p3 = scmp.lt.s32.totalorder (!%p193_p2), %s630_s19, 1  ;;  %s745_s24 = smov (!%p193_p2), 17  }
   0x6   : > { %196 = sbr.rel (%p193_p2) target bundleno = 627 (0x273), region = 32  ;;  %s746_s25 = smov (!%p193_p2), 94  }
   0x7   : > { %s747_s26 = smov (!%p193_p2), 96   ;;  %s748_s27 = smov (!%p193_p2), 95  }
   0x8   : > { %s749_s28 = smov (!%p193_p2), 111   ;;  %s750_s29 = smov (!%p193_p2), 110  }
   0x9   : > { %s751_s30 = smov (!%p193_p2), 126   ;;  %s752_s6 = smov (!%p193_p2), 112  }
   0xa   : > { %s754_s7 = smov (!%p193_p2), 127  }
   0xb   : > { %s920_s19 = smov (!%p228_p3, %s630_s19), 1  ;;  %vm255_vm0 = vcmask 138240   ;;  %v753_v11 = vmov 0   ;;  %v442_v12 = vld [vmem:[%s903_s2] sm:$0xff]  ;;  %v262_v13 = vlaneseq  ;;  %vm404_vm1 = vcmask 769024  }
   0xc   : > { %s645_s20 = sshll.u32 %s920_s19, 4  ;;  %491 = vmatprep.mubr.bf16.mxu0 %v753_v11  ;;  %735 = vset.pattern.permute.xlu1 %v753_v11  ;;  %vm376_vm4 = vcmask 785408   ;;  %vm452_vm5 = vcmask 1043456   ;;  %vm391_vm6 = vcmask 777216   ;;  %vm755_vm8 = vmmov 1   ;;  %s639_s15 = sshll.u32 %s920_s19, 3 }
   0xd   : > { %s232_s23 = scalar_lea.vmem %s901_s0, %s645_s20  ;;  %736 = vset.pattern.permute.xlu0 %v753_v11  ;;  %v263_v14 = vand.u32 127, %v262_v13  ;;  %vm348_vm12 = vcmask 908288   ;;  %vm361_vm13 = vcmask 900096   ;;  %v413_v23 = vld [vmem:[%s902_s1] sm:$0xf]  ;;  %s237_s14 = scalar_lea.vmem %s904_s3, %s645_s20 }
   0xe   : > { %v247_v0 = vld [vmem:[%s232_s23] sm:$0xff]  ;;  %v248_v1 = vld [vmem:[%s232_s23 + $0x8] sm:$0xff]  ;;  %s241_s21 = scalar_lea.vmem %s905_s4, %s639_s15  ;;  %s245_s23 = scalar_lea.vmem %s906_s5, %s639_s15 }
   0xf   : > { %v690_v2 = vpack.i.bf16 %v248_v1, %v247_v0  ;;  %v264_v15 = vadd.s32 128, %v263_v14  ;;  %v269_v17 = vand.u32 15, %v263_v14 }
  0x11   : > { %691 = vrot.lane.b32.xlu0 %v690_v2, %s745_s24  ;;  %v276_v16 = vand.u32 15, %v264_v15  ;;  %vm823_vm3 = vcmp.ne.s32.totalorder %v269_v17, 15  ;;  %vm845_vm10 = vcmp.ne.s32.totalorder %v269_v17, 0 }
  0x12   : > { %vm857_vm11 = vmpackc.low %vm755_vm8, %vm845_vm10 }
  0x13   : > { %vm819_vm2 = vcmp.ne.s32.totalorder %v276_v16, 15  ;;  %vm831_vm7 = vcmp.ne.s32.totalorder %v276_v16, 0  ;;  %vm656_vm15 = vmpackc.low %vm823_vm3, %vm755_vm8 }
  0x14   : > { %vm841_vm9 = vmpackc.low %vm755_vm8, %vm831_vm7 }
  0x15   : > { %vm653_vm14 = vmpackc.low %vm819_vm2, %vm755_vm8 }
  0x83   : > { %v692_v3 = vpop.permute.xlu0 %691 }
  0x84   : > { %v694_v4 = vunpack.i.h.bf16 %v692_v3  ;;  %v693_v5 = vunpack.i.l.bf16 %v692_v3 }
  0x86   : > { %v261_v6 = vsel %vm255_vm0, %v694_v4, 0.0  ;;  %v802_v7 = vsel %vm255_vm0, %v693_v5, %v694_v4  ;;  %v804_v8 = vsel %vm255_vm0, 0.0, %v693_v5  ;;  %vm318_vm0 = vcmask 1031168  }
  0x87   : > { %402 = vrot.lane.b32.xlu1 %v261_v6, %s746_s25  ;;  %v695_v9 = vpack.i.bf16 %v802_v7, %v804_v8  ;;  %v700_v10 = vpack.i.bf16 %v261_v6, %v802_v7 }
  0x89   : > { %696 = vrot.lane.b32.xlu0 %v695_v9, %s746_s25 }
  0x8b   : > { %701 = vrot.lane.b32.xlu1 %v700_v10, %s747_s26 }
  0x8d   : > { %706 = vrot.lane.b32.xlu0 %v700_v10, %s748_s27 }
  0x8f   : > { %370 = vrot.lane.b32.xlu1 %v804_v8, %s747_s26 }
  0x91   : > { %385 = vrot.lane.b32.xlu0 %v804_v8, %s748_s27 }
  0x93   : > { %711 = vrot.lane.b32.xlu1 %v700_v10, %s749_s28 }
  0x95   : > { %716 = vrot.lane.b32.xlu0 %v700_v10, %s750_s29 }
  0x97   : > { %342 = vrot.lane.b32.xlu1 %v804_v8, %s749_s28 }
  0x99   : > { %355 = vrot.lane.b32.xlu0 %v804_v8, %s750_s29 }
  0x9b   : > { %721 = vrot.lane.b32.xlu1 %v700_v10, %s751_s30 }
  0x9d   : > { %726 = vrot.lane.b32.xlu0 %v700_v10, %s752_s6 }
  0x9f   : > { %312 = vrot.lane.b32.xlu1 %v804_v8, %s751_s30 }
  0xa1   : > { %327 = vrot.lane.b32.xlu0 %v804_v8, %s752_s6 }
  0xa3   : > { %731 = vrot.lane.b32.xlu1 %v700_v10, %s754_s7 }
  0xa5   : > { %299 = vrot.lane.b32.xlu0 %v804_v8, %s754_s7 }
  0xa7   : > { %445 = vperm.xlu1 %735, %v442_v12  }
  0xf9   : > { %v403_v18 = vpop.permute.xlu1 %402 }
  0xfb   : > { %v697_v19 = vpop.permute.xlu0 %696 }
  0xfc   : > { %v699_v20 = vunpack.i.h.bf16 %v697_v19  ;;  %v698_v21 = vunpack.i.l.bf16 %v697_v19 }
  0xfd   : > { %v702_v24 = vpop.permute.xlu1 %701 }
  0xfe   : > { %v704_v25 = vunpack.i.h.bf16 %v702_v24  ;;  %v703_v26 = vunpack.i.l.bf16 %v702_v24  ;;  %v406_v27 = vsel %vm404_vm1, %v699_v20, %v403_v18  ;;  %v405_v28 = vsel %vm404_vm1, %v698_v21, %v699_v20 }
  0xff   : > { %v707_v29 = vpop.permute.xlu0 %706  ;;  %v410_v30 = vsel %vm819_vm2, %v406_v27, 0.0  ;;  %v409_v31 = vsel %vm823_vm3, %v405_v28, 0.0  ;;  %vm333_vm1 = vcmask 916480  }
 0x100   : > { %v709_v33 = vunpack.i.h.bf16 %v707_v29  ;;  %v708_v34 = vunpack.i.l.bf16 %v707_v29  ;;  %v441_v35 = vpack.c.bf16 %v410_v30, %v410_v30  ;;  %v440_v37 = vpack.c.bf16 %v409_v31, %v409_v31 }
 0x101   : > { %v371_v36 = vpop.permute.xlu1 %370  ;;  %v378_v38 = vsel %vm376_vm4, %v703_v26, %v704_v25 }
 0x102   : > { %641 = vmatprep.subr.msk.bf16.mxu0 %vm452_vm5, %v441_v35  ;;  %v393_v39 = vsel %vm391_vm6, %v708_v34, %v709_v33  ;;  %v454_v44 = vsel %vm452_vm5, %v440_v37, 0  ;;  %v377_v45 = vsel %vm376_vm4, %v371_v36, %v703_v26  ;;  %vm659_vm4 = vmpackc.low %vm831_vm7, %vm819_vm2  ;;  %vm448_vm2 = vcmask 588800  }
 0x103   : > { %v386_v42 = vpop.permute.xlu0 %385  ;;  %v648_v43 = vpack.c.bf16 %v393_v39, %v378_v38  ;;  %466 = vmatpush1.bf16.msra.mxu0 %v454_v44  ;;  %vm662_vm5 = vmpackc.low %vm845_vm10, %vm823_vm3  ;;  %vm503_vm3 = vcmask 7168  }
 0x104   : > { %v392_v46 = vsel %vm391_vm6, %v386_v42, %v708_v34  ;;  %vm305_vm6 = vcmask 1039360  }
 0x105   : > { %v651_v47 = vpack.c.bf16 %v392_v46, %v377_v45  ;;  %v712_v48 = vpop.permute.xlu1 %711  ;;  %649 = vmatprep.subr.msk.bf16.mxu0 %vm841_vm9, %v648_v43 }
 0x106   : > { %v714_v50 = vunpack.i.h.bf16 %v712_v48  ;;  %v713_v51 = vunpack.i.l.bf16 %v712_v48 }
 0x107   : > { %v717_v52 = vpop.permute.xlu0 %716  ;;  %652 = vmatpush1.bf16.msk.msra.mxu0 %vm857_vm11, %v651_v47 }
 0x108   : > { %v719_v53 = vunpack.i.h.bf16 %v717_v52  ;;  %v718_v54 = vunpack.i.l.bf16 %v717_v52  ;;  %v350_v56 = vsel %vm348_vm12, %v713_v51, %v714_v50 }
 0x109   : > { %v343_v55 = vpop.permute.xlu1 %342 }
 0x10a   : > { %v363_v57 = vsel %vm361_vm13, %v718_v54, %v719_v53  ;;  %v349_v60 = vsel %vm348_vm12, %v343_v55, %v713_v51 }
 0x10b   : > { %v356_v58 = vpop.permute.xlu0 %355  ;;  %v654_v59 = vpack.c.bf16 %v363_v57, %v350_v56 }
 0x10c   : > { %v362_v61 = vsel %vm361_vm13, %v356_v58, %v718_v54 }
 0x10d   : > { %v657_v62 = vpack.c.bf16 %v362_v61, %v349_v60  ;;  %v722_v63 = vpop.permute.xlu1 %721  ;;  %655 = vmatprep.subr.msk.bf16.mxu0 %vm653_vm14, %v654_v59 }
 0x10e   : > { %v724_v0 = vunpack.i.h.bf16 %v722_v63  ;;  %v723_v1 = vunpack.i.l.bf16 %v722_v63 }
 0x10f   : > { %v727_v2 = vpop.permute.xlu0 %726  ;;  %658 = vmatpush1.bf16.msk.msra.mxu0 %vm656_vm15, %v657_v62 }
 0x110   : > { %v729_v3 = vunpack.i.h.bf16 %v727_v2  ;;  %v728_v4 = vunpack.i.l.bf16 %v727_v2  ;;  %v320_v6 = vsel %vm318_vm0, %v723_v1, %v724_v0 }
 0x111   : > { %v313_v5 = vpop.permute.xlu1 %312 }
 0x112   : > { %v335_v9 = vsel %vm333_vm1, %v728_v4, %v729_v3  ;;  %v319_v12 = vsel %vm318_vm0, %v313_v5, %v723_v1 }
 0x113   : > { %v328_v10 = vpop.permute.xlu0 %327  ;;  %v660_v11 = vpack.c.bf16 %v335_v9, %v320_v6 }
 0x114   : > { %v334_v13 = vsel %vm333_vm1, %v328_v10, %v728_v4 }
 0x115   : > { %v663_v14 = vpack.c.bf16 %v334_v13, %v319_v12  ;;  %v732_v15 = vpop.permute.xlu1 %731  ;;  %661 = vmatprep.subr.msk.bf16.mxu0 %vm659_vm4, %v660_v11 }
 0x116   : > { %v734_v16 = vunpack.i.h.bf16 %v732_v15  ;;  %v733_v17 = vunpack.i.l.bf16 %v732_v15 }
 0x117   : > { %v300_v18 = vpop.permute.xlu0 %299  ;;  %664 = vmatpush1.bf16.msk.msra.mxu0 %vm662_vm5, %v663_v14 }
 0x118   : > { %v307_v19 = vsel %vm305_vm6, %v733_v17, %v734_v16  ;;  %v306_v20 = vsel %vm305_vm6, %v300_v18, %v733_v17 }
 0x119   : > { %v666_v21 = vpack.c.bf16 %v307_v19, %v802_v7  ;;  %v669_v22 = vpack.c.bf16 %v306_v20, %v804_v8 }
 0x11b   : > { %667 = vmatprep.subr.msk.bf16.mxu0 %vm841_vm9, %v666_v21 }
 0x11c   : > { %670 = vmatpush1.bf16.msk.msra.mxu0 %vm857_vm11, %v669_v22 }
 0x11f   : > { %642 = vmatmul.mubr.msk.bf16.vlgmr.msra.gmra.mxu0 %vm448_vm2, %v413_v23 }
 0x122   : > { %v446_v24 = vpop.permute.xlu1 %445 }
 0x1df   : > { %v493_v7 = vpop.f32.mrf.mxu0 }
 0x1e0   : > { %v494_v8 = vadd.f32 %v493_v7, %v446_v24 }
 0x1e1   : > { %v495_v25 = vpop.f32.mrf.mxu0 }
 0x1e2   : > { %511 = vst [vmem:[%s237_s14] sm:$0xff] %v494_v8  ;;  %v496_v26 = vadd.f32 %v495_v25, %v446_v24  ;;  %v505_v29 = vmul.f32 %v494_v8, %v494_v8 }
 0x1e3   : > { %v497_v27 = vpop.f32.mrf.mxu0 }
 0x1e4   : > { %512 = vst [vmem:[%s237_s14 + $0x8] sm:$0xff] %v496_v26  ;;  %v500_v28 = vadd.f32 %v496_v26, %v494_v8  ;;  %v506_v30 = vmul.f32 %v496_v26, %v496_v26 }
 0x1e5   : > { %v498_v31 = vpop.f32.mrf.mxu0 }
 0x1e6   : > { %501 = vadd.xlane.f32.xlu0 %v500_v28  ;;  %v507_v32 = vadd.f32 %v506_v30, %v505_v29 }
 0x1e8   : > { %508 = vadd.xlane.f32.xlu1 %v507_v32 }
 0x26f   : > { %v502_v33 = vpop.xlane.xlu0 %501 }
 0x270   : > { %504 = vst.msk [vmem:[%s241_s21] sm:$0xff] %vm503_vm3, %v502_v33 }
 0x271   : > { %v509_v34 = vpop.xlane.xlu1 %508 }
 0x272   : > { %510 = vst.msk [vmem:[%s245_s23] sm:$0xff] %vm503_vm3, %v509_v34 }
 0x273 PF: > { %s16_s18 = sadd.s32 1, %s743_s18  }
 0x274   : > { %p13_p4 = scmp.ge.s32.totalorder %s16_s18, 4  }
 0x276   :  { %15 = sbr.rel (!%p13_p4) target bundleno = 1 (0x1), region = 86 }

// kernel: decoder_forward.4
= control target key start
LH: loop header
LB: loop body
LE: loop exit
PB: predicated region body
PF: predicated region fallthrough
CT: control target
= control target key end

     0   :  { %s875_s24 = smov 0   ;;  %s997_s0 = inlined_call_operand.vmem [shape: f32[2,8,256], index: 0, kind: input, shape index: {}]   ;;  %s998_s1 = inlined_call_operand.vmem [shape: f32[8,1], index: 1, kind: input, shape index: {}]   ;;  %s999_s2 = inlined_call_operand.vmem [shape: f32[8,1], index: 2, kind: input, shape index: {}]   ;;  %s1000_s3 = inlined_call_operand.vmem [shape: bf16[4,72], index: 3, kind: input, shape index: {}]   ;;  %s1001_s4 = inlined_call_operand.vmem [shape: f32[4,1], index: 4, kind: input, shape index: {}]   ;;  %s1002_s5 = inlined_call_operand.vmem [shape: f32[2,4,256], index: 5, kind: output, shape index: {0}]   ;;  %s1003_s6 = inlined_call_operand.vmem [shape: f32[2,4,1], index: 6, kind: output, shape index: {1}]   ;;  %s1004_s7 = inlined_call_operand.vmem [shape: f32[2,4,1], index: 7, kind: output, shape index: {2}]  }
   0x1 LB: > { %s709_s25 = sadd.s32 4294967295, %s822_s24   ;;  %p713_p0 = scmp.ge.s32.totalorder %s822_s24, 1  ;;  %s822_s24 = sphi %s875_s24, %s18_s24  }
   0x2   : > { %p242_p1 = scmp.lt.s32.totalorder %s822_s24, 3 }
   0x4   : > { %p243_p2 = pnand %p713_p0, %p242_p1 }
   0x5   : > { %p282_p3 = scmp.lt.s32.totalorder (!%p243_p2), %s709_s25, 1  ;;  %s825_s11 = smov (!%p243_p2), 17  }
   0x6   : > { %246 = sbr.rel (%p243_p2) target bundleno = 760 (0x2f8), region = 40  ;;  %s826_s12 = smov (!%p243_p2), 94  }
   0x7   : > { %s827_s13 = smov (!%p243_p2), 95   ;;  %s828_s14 = smov (!%p243_p2), 96  }
   0x8   : > { %s829_s15 = smov (!%p243_p2), 110   ;;  %s830_s16 = smov (!%p243_p2), 111  }
   0x9   : > { %s831_s17 = smov (!%p243_p2), 112   ;;  %s832_s18 = smov (!%p243_p2), 126  }
   0xa   : > { %s833_s19 = smov (!%p243_p2), 127  }
   0xb   : > { %v303_v0 = vld [vmem:[%s998_s1] sm:$0xff]  ;;  %v824_v1 = vmov 0   ;;  %s1018_s25 = smov (!%p282_p3, %s709_s25), 1  ;;  %vm327_vm0 = vcmask 138240   ;;  %v334_v23 = vlaneseq  ;;  %vm476_vm1 = vcmask 769024  }
   0xc   : > { %769 = vset.pattern.permute.xlu0 %v824_v1  ;;  %563 = vmatprep.mubr.bf16.mxu0 %v824_v1  ;;  %v311_v2 = vld [vmem:[%s999_s2] sm:$0xff]  ;;  %s724_s30 = sshll.u32 %s1018_s25, 4  ;;  %vm463_vm4 = vcmask 777216   ;;  %vm524_vm5 = vcmask 1043456   ;;  %vm448_vm6 = vcmask 785408   ;;  %vm834_vm8 = vmmov 1  }
   0xd   : > { %306 = vperm.xlu0 %769, %v303_v0   ;;  %815 = vset.pattern.permute.xlu1 %v824_v1  ;;  %s286_s10 = scalar_lea.vmem %s997_s0, %s724_s30  ;;  %v514_v22 = vld [vmem:[%s1001_s4] sm:$0xf]  ;;  %v335_v24 = vand.u32 127, %v334_v23  ;;  %vm433_vm12 = vcmask 900096   ;;  %vm420_vm13 = vcmask 908288   ;;  %s725_s26 = sshll.u32 %s1018_s25, 3 }
   0xe   : > { %v301_v4 = vld [vmem:[%s286_s10] sm:$0xff]  ;;  %v302_v5 = vld [vmem:[%s286_s10 + $0x8] sm:$0xff]  ;;  %s291_s29 = scalar_lea.vmem %s1002_s5, %s725_s26  ;;  %s718_s30 = sshll.u32 %s1018_s25, 2 }
   0xf   : > { %v336_v25 = vadd.s32 128, %v335_v24  ;;  %v341_v27 = vand.u32 15, %v335_v24  ;;  %v485_v33 = vld [vmem:[%s1000_s3] sm:$0x3]  ;;  %s295_s10 = scalar_lea.vmem %s1003_s6, %s718_s30 }
  0x11   : > { %314 = vperm.xlu0 %769, %v311_v2   ;;  %v348_v26 = vand.u32 15, %v336_v25  ;;  %vm916_vm3 = vcmp.ne.s32.totalorder %v341_v27, 15  ;;  %vm938_vm10 = vcmp.ne.s32.totalorder %v341_v27, 0 }
  0x12   : > { %vm950_vm11 = vmpackc.low %vm834_vm8, %vm938_vm10 }
  0x13   : > { %vm912_vm2 = vcmp.ne.s32.totalorder %v348_v26, 15  ;;  %vm924_vm7 = vcmp.ne.s32.totalorder %v348_v26, 0  ;;  %vm735_vm15 = vmpackc.low %vm916_vm3, %vm834_vm8 }
  0x14   : > { %vm934_vm9 = vmpackc.low %vm834_vm8, %vm924_vm7 }
  0x15   : > { %vm732_vm14 = vmpackc.low %vm912_vm2, %vm834_vm8  ;;  %vm377_vm8 = vcmask 1039360  }
  0x88   : > { %v307_v3 = vpop.permute.xlu0 %306 }
  0x89   : > { %v309_v6 = vmul.f32 %v307_v3, %v301_v4  ;;  %v310_v7 = vmul.f32 %v307_v3, %v302_v5 }
  0x8c   : > { %v315_v8 = vpop.permute.xlu0 %314 }
  0x8d   : > { %v317_v9 = vadd.f32 %v315_v8, %v309_v6  ;;  %v318_v10 = vadd.f32 %v315_v8, %v310_v7 }
  0x8f   : > { %v319_v11 = vmax.f32 %v317_v9, 0.0  ;;  %v320_v12 = vmax.f32 %v318_v10, 0.0 }
  0x91   : > { %v770_v13 = vpack.i.bf16 %v320_v12, %v319_v11 }
  0x93   : > { %771 = vrot.lane.b32.xlu1 %v770_v13, %s825_s11 }
 0x105   : > { %v772_v14 = vpop.permute.xlu1 %771 }
 0x106   : > { %v774_v15 = vunpack.i.h.bf16 %v772_v14  ;;  %v773_v16 = vunpack.i.l.bf16 %v772_v14 }
 0x108   : > { %v333_v17 = vsel %vm327_vm0, %v774_v15, 0.0  ;;  %v895_v18 = vsel %vm327_vm0, %v773_v16, %v774_v15  ;;  %v897_v19 = vsel %vm327_vm0, 0.0, %v773_v16  ;;  %vm405_vm0 = vcmask 916480  }
 0x109   : > { %474 = vrot.lane.b32.xlu0 %v333_v17, %s826_s12  ;;  %v775_v20 = vpack.i.bf16 %v895_v18, %v897_v19  ;;  %v785_v21 = vpack.i.bf16 %v333_v17, %v895_v18 }
 0x10b   : > { %776 = vrot.lane.b32.xlu1 %v775_v20, %s826_s12 }
 0x10d   : > { %786 = vrot.lane.b32.xlu0 %v785_v21, %s827_s13 }
 0x10f   : > { %781 = vrot.lane.b32.xlu1 %v785_v21, %s828_s14 }
 0x111   : > { %457 = vrot.lane.b32.xlu0 %v897_v19, %s827_s13  ;;  %s299_s13 = scalar_lea.vmem %s1004_s7, %s718_s30 }
 0x113   : > { %442 = vrot.lane.b32.xlu1 %v897_v19, %s828_s14 }
 0x115   : > { %796 = vrot.lane.b32.xlu0 %v785_v21, %s829_s15 }
 0x117   : > { %791 = vrot.lane.b32.xlu1 %v785_v21, %s830_s16 }
 0x119   : > { %427 = vrot.lane.b32.xlu0 %v897_v19, %s829_s15 }
 0x11b   : > { %414 = vrot.lane.b32.xlu1 %v897_v19, %s830_s16 }
 0x11d   : > { %806 = vrot.lane.b32.xlu0 %v785_v21, %s831_s17 }
 0x11f   : > { %801 = vrot.lane.b32.xlu1 %v785_v21, %s832_s18 }
 0x121   : > { %399 = vrot.lane.b32.xlu0 %v897_v19, %s831_s17 }
 0x123   : > { %384 = vrot.lane.b32.xlu1 %v897_v19, %s832_s18 }
 0x125   : > { %371 = vrot.lane.b32.xlu0 %v897_v19, %s833_s19 }
 0x127   : > { %811 = vrot.lane.b32.xlu1 %v785_v21, %s833_s19 }
 0x12b   : > { %517 = vperm.xlu1 %815, %v514_v22  }
 0x17b   : > { %v475_v28 = vpop.permute.xlu0 %474 }
 0x17d   : > { %v777_v29 = vpop.permute.xlu1 %776 }
 0x17e   : > { %v779_v30 = vunpack.i.h.bf16 %v777_v29  ;;  %v778_v31 = vunpack.i.l.bf16 %v777_v29 }
 0x17f   : > { %v787_v34 = vpop.permute.xlu0 %786 }
 0x180   : > { %v789_v35 = vunpack.i.h.bf16 %v787_v34  ;;  %v788_v36 = vunpack.i.l.bf16 %v787_v34  ;;  %v478_v37 = vsel %vm476_vm1, %v779_v30, %v475_v28  ;;  %v477_v38 = vsel %vm476_vm1, %v778_v31, %v779_v30 }
 0x181   : > { %v782_v39 = vpop.permute.xlu1 %781  ;;  %v482_v40 = vsel %vm912_vm2, %v478_v37, 0.0  ;;  %v481_v41 = vsel %vm916_vm3, %v477_v38, 0.0  ;;  %vm390_vm1 = vcmask 1031168  }
 0x182   : > { %v784_v43 = vunpack.i.h.bf16 %v782_v39  ;;  %v783_v44 = vunpack.i.l.bf16 %v782_v39  ;;  %v513_v45 = vpack.c.bf16 %v482_v40, %v482_v40  ;;  %v512_v47 = vpack.c.bf16 %v481_v41, %v481_v41 }
 0x183   : > { %v458_v46 = vpop.permute.xlu0 %457  ;;  %v465_v48 = vsel %vm463_vm4, %v788_v36, %v789_v35 }
 0x184   : > { %720 = vmatprep.subr.msk.bf16.mxu0 %vm524_vm5, %v513_v45  ;;  %v450_v49 = vsel %vm448_vm6, %v783_v44, %v784_v43  ;;  %v526_v54 = vsel %vm524_vm5, %v512_v47, 0  ;;  %v464_v55 = vsel %vm463_vm4, %v458_v46, %v788_v36  ;;  %vm738_vm4 = vmpackc.low %vm924_vm7, %vm912_vm2  ;;  %vm520_vm2 = vcmask 588800  }
 0x185   : > { %v443_v52 = vpop.permute.xlu1 %442  ;;  %v727_v53 = vpack.c.bf16 %v465_v48, %v450_v49  ;;  %538 = vmatpush1.bf16.msra.mxu0 %v526_v54 }
 0x186   : > { %v449_v56 = vsel %vm448_vm6, %v443_v52, %v783_v44  ;;  %vm741_vm6 = vmpackc.low %vm938_vm10, %vm916_vm3  ;;  %vm577_vm3 = vcmask 3072  }
 0x187   : > { %v730_v57 = vpack.c.bf16 %v464_v55, %v449_v56  ;;  %v797_v58 = vpop.permute.xlu0 %796  ;;  %728 = vmatprep.subr.msk.bf16.mxu0 %vm934_vm9, %v727_v53 }
 0x188   : > { %v799_v60 = vunpack.i.h.bf16 %v797_v58  ;;  %v798_v61 = vunpack.i.l.bf16 %v797_v58 }
 0x189   : > { %v792_v62 = vpop.permute.xlu1 %791  ;;  %731 = vmatpush1.bf16.msk.msra.mxu0 %vm950_vm11, %v730_v57 }
 0x18a   : > { %v794_v63 = vunpack.i.h.bf16 %v792_v62  ;;  %v793_v0 = vunpack.i.l.bf16 %v792_v62  ;;  %v435_v2 = vsel %vm433_vm12, %v798_v61, %v799_v60 }
 0x18b   : > { %v428_v1 = vpop.permute.xlu0 %427 }
 0x18c   : > { %v422_v3 = vsel %vm420_vm13, %v793_v0, %v794_v63  ;;  %v434_v6 = vsel %vm433_vm12, %v428_v1, %v798_v61 }
 0x18d   : > { %v415_v4 = vpop.permute.xlu1 %414  ;;  %v733_v5 = vpack.c.bf16 %v435_v2, %v422_v3 }
 0x18e   : > { %v421_v7 = vsel %vm420_vm13, %v415_v4, %v793_v0 }
 0x18f   : > { %v736_v8 = vpack.c.bf16 %v434_v6, %v421_v7  ;;  %v807_v9 = vpop.permute.xlu0 %806  ;;  %734 = vmatprep.subr.msk.bf16.mxu0 %vm732_vm14, %v733_v5 }
 0x190   : > { %v809_v10 = vunpack.i.h.bf16 %v807_v9  ;;  %v808_v11 = vunpack.i.l.bf16 %v807_v9 }
 0x191   : > { %v802_v12 = vpop.permute.xlu1 %801  ;;  %737 = vmatpush1.bf16.msk.msra.mxu0 %vm735_vm15, %v736_v8 }
 0x192   : > { %v804_v13 = vunpack.i.h.bf16 %v802_v12  ;;  %v803_v14 = vunpack.i.l.bf16 %v802_v12  ;;  %v407_v16 = vsel %vm405_vm0, %v808_v11, %v809_v10 }
 0x193   : > { %v400_v15 = vpop.permute.xlu0 %399 }
 0x194   : > { %v392_v17 = vsel %vm390_vm1, %v803_v14, %v804_v13  ;;  %v406_v22 = vsel %vm405_vm0, %v400_v15, %v808_v11 }
 0x195   : > { %v385_v20 = vpop.permute.xlu1 %384  ;;  %v739_v21 = vpack.c.bf16 %v407_v16, %v392_v17 }
 0x196   : > { %v391_v23 = vsel %vm390_vm1, %v385_v20, %v803_v14 }
 0x197   : > { %v742_v24 = vpack.c.bf16 %v406_v22, %v391_v23  ;;  %740 = vmatprep.subr.msk.bf16.mxu0 %vm738_vm4, %v739_v21  ;;  %v372_v28 = vpop.permute.xlu0 %371 }
 0x199   : > { %v812_v25 = vpop.permute.xlu1 %811  ;;  %743 = vmatpush1.bf16.msk.msra.mxu0 %vm741_vm6, %v742_v24 }
 0x19a   : > { %v814_v26 = vunpack.i.h.bf16 %v812_v25  ;;  %v813_v27 = vunpack.i.l.bf16 %v812_v25 }
 0x19c   : > { %v378_v29 = vsel %vm377_vm8, %v372_v28, %v813_v27  ;;  %v379_v30 = vsel %vm377_vm8, %v813_v27, %v814_v26 }
 0x19d   : > { %v745_v31 = vpack.c.bf16 %v379_v30, %v895_v18  ;;  %v748_v32 = vpack.c.bf16 %v378_v29, %v897_v19 }
 0x19f   : > { %746 = vmatprep.subr.msk.bf16.mxu0 %vm934_vm9, %v745_v31 }
 0x1a0   : > { %749 = vmatpush1.bf16.msk.msra.mxu0 %vm950_vm11, %v748_v32 }
 0x1a3   : > { %721 = vmatmul.mubr.msk.bf16.vlgmr.msra.gmra.mxu0 %vm520_vm2, %v485_v33 }
 0x1a6   : > { %v518_v34 = vpop.permute.xlu1 %517 }
 0x263   : > { %v565_v35 = vpop.f32.mrf.mxu0 }
 0x264   : > { %v566_v36 = vadd.f32 %v565_v35, %v518_v34 }
 0x265   : > { %v567_v37 = vpop.f32.mrf.mxu0 }
 0x266   : > { %v568_v18 = vadd.f32 %v567_v37, %v518_v34  ;;  %v579_v19 = vmul.f32 %v566_v36, %v566_v36  ;;  %v572_v40 = vsel %vm524_vm5, %v566_v36, 0.0 }
 0x267   : > { %v569_v38 = vpop.f32.mrf.mxu0 }
 0x268   : > { %v589_v39 = vcombine.low %v566_v36, %v568_v18  ;;  %v573_v41 = vsel %vm524_vm5, %v568_v18, 0.0  ;;  %v580_v42 = vmul.f32 %v568_v18, %v568_v18  ;;  %v581_v45 = vsel %vm524_vm5, %v579_v19, 0.0 }
 0x269   : > { %v570_v43 = vpop.f32.mrf.mxu0  ;;  %v574_v44 = vadd.f32 %v573_v41, %v572_v40 }
 0x26a   : > { %591 = vst [vmem:[%s291_s29] sm:$0xff] %v589_v39  ;;  %v582_v46 = vsel %vm524_vm5, %v580_v42, 0.0 }
 0x26b   : > { %575 = vadd.xlane.f32.xlu0 %v574_v44  ;;  %v583_v47 = vadd.f32 %v582_v46, %v581_v45 }
 0x26d   : > { %584 = vadd.xlane.f32.xlu1 %v583_v47 }
 0x2f4   : > { %v576_v48 = vpop.xlane.xlu0 %575 }
 0x2f5   : > { %578 = vst.msk [vmem:[%s295_s10] sm:$0xf] %vm577_vm3, %v576_v48 }
 0x2f6   : > { %v585_v49 = vpop.xlane.xlu1 %584 }
 0x2f7   : > { %586 = vst.msk [vmem:[%s299_s13] sm:$0xf] %vm577_vm3, %v585_v49 }
 0x2f8 PF: > { %s18_s24 = sadd.s32 1, %s822_s24  }
 0x2f9   : > { %p15_p4 = scmp.ge.s32.totalorder %s18_s24, 4  }
 0x2fb   :  { %17 = sbr.rel (!%p15_p4) target bundleno = 1 (0x1), region = 94 }

</bundles_post_ra>
